<compile_context>
chip_gen: v5e
topology: v5e:2x2
jax: 0.10.0
libtpu: 0.0.40
codegen_flags: <defaults>
</compile_context>

<pallas_src>
import functools
import math

import jax
import jax.numpy as jnp
from jax import lax
from jax.experimental import pallas as pl
from jax.experimental.pallas import tpu as pltpu


def _round_up(x: int, m: int) -> int:
    return ((x + m - 1) // m) * m


def _sublane_multiple(dtype) -> int:
    """Minimum row multiple for a full-speed tile of this dtype."""
    bits = jnp.dtype(dtype).itemsize * 8
    if bits >= 32:
        return 8
    if bits == 16:
        return 16
    return 32


def _linear_gelu_kernel(x_ref, w_ref, b_ref, o_ref, acc_ref, *, precision):
    """One (i, j, k) grid step of GELU(x @ W + b) with W already (K, N).

    x_ref:   (tm, tk)  activation tile
    w_ref:   (tk, tn)  weight tile, pre-transposed to (K, N) in the wrapper
    b_ref:   (1, tn)   bias tile (block index constant in k -> VMEM resident)
    o_ref:   (tm, tn)  output tile (resident across the K axis)
    acc_ref: (tm, tn)  f32 accumulator scratch, persistent across the K axis
    """
    k_step = pl.program_id(2)

    @pl.when(k_step == 0)
    def _init():
        # Bias-as-init: saves a zero-fill store plus a full-tile add in the
        # epilogue (relieves the single vst slot, esp. on v5e).
        acc_ref[...] = jnp.broadcast_to(
            b_ref[...].astype(jnp.float32), acc_ref.shape
        )

    # Pure MXU accumulate: (tm, tk) x (tk, tn), no per-step transpose.
    acc_ref[...] += lax.dot_general(
        x_ref[...],
        w_ref[...],
        dimension_numbers=(((1,), (0,)), ((), ())),
        preferred_element_type=jnp.float32,
        precision=precision,
    )

    # Finalize only on the last K step: exact (erf) GELU + store.
    @pl.when(k_step == pl.num_programs(2) - 1)
    def _finalize():
        y = acc_ref[...]
        inv_sqrt2 = jnp.float32(1.0 / math.sqrt(2.0))
        o_ref[...] = (0.5 * y * (1.0 + lax.erf(y * inv_sqrt2))).astype(o_ref.dtype)


def linear_block(
    x: jax.Array,
    weight: jax.Array,
    bias: jax.Array,
    *,
    tm_cap: int = 512,
    tn_cap: int = 512,
    tk_cap: int = 1024,
    precision=lax.Precision.HIGHEST,
) -> jax.Array:
    """GELU(x @ weight.T + bias), matching the PyTorch LinearBlock forward.

    x:      (..., in_channels)
    weight: (out_channels, in_channels)  -- native PyTorch nn.Linear layout
    bias:   (out_channels,)
    """
    orig_shape = x.shape
    k = orig_shape[-1]
    n, k2 = weight.shape
    assert k == k2, "in_channels mismatch"
    assert bias.shape == (n,)

    x2 = x.reshape(-1, k)
    m = x2.shape[0]

    # Pad to lane/sublane-friendly sizes. K padding with zeros keeps the
    # matmul exact; padded M rows / N cols are sliced off the output.
    sub_m = _sublane_multiple(x.dtype)
    mp = _round_up(m, sub_m)
    kp = _round_up(k, 128)
    np_ = _round_up(n, 128)

    # tm: keep the whole M dimension in one tile when modest, so the weight
    # (usually the big operand) streams through HBM exactly once.
    tm = mp if mp <= 1024 else min(tm_cap, mp)
    tn = min(tn_cap, np_)
    tk = min(tk_cap, kp)

    # v7x: if both M and N collapse to a single block, split N so both
    # TensorCores get work (only when it does not add extra padding).
    if mp <= tm and np_ <= tn and np_ % 256 == 0:
        tn = np_ // 2

    mp = _round_up(mp, tm)
    np_ = _round_up(np_, tn)
    kp = _round_up(kp, tk)

    # One-time HBM transpose of the weight to (K, N); amortized over all M
    # tiles (and across calls if the weight is static / jitted).
    w_t = weight.T
    x_p = x2 if (mp == m and kp == k) else jnp.pad(x2, ((0, mp - m), (0, kp - k)))
    w_p = w_t if (kp == k and np_ == n) else jnp.pad(w_t, ((0, kp - k), (0, np_ - n)))
    b_p = (bias if np_ == n else jnp.pad(bias, (0, np_ - n))).reshape(1, np_)

    grid = (mp // tm, np_ // tn, kp // tk)

    # VMEM budget from the actual tile footprint (double-buffered x/W/bias/out
    # + f32 accumulator, 2x headroom), clamped to 48 MiB: safe on v7x (64 MiB
    # physical) and comfortably under v5e/v6e's 128 MiB.
    xb = jnp.dtype(x.dtype).itemsize
    wb = jnp.dtype(weight.dtype).itemsize
    ob = xb
    tile_bytes = (
        2 * (tm * tk * xb + tk * tn * wb + tn * 4 + tm * tn * ob) + tm * tn * 4
    )
    vmem_limit = int(min(max(2 * tile_bytes, 4 * 1024 * 1024), 48 * 1024 * 1024))

    cost = pl.CostEstimate(
        flops=2 * mp * np_ * kp,
        transcendentals=mp * np_,
        bytes_accessed=(x_p.size * xb + w_p.size * wb + b_p.size * 4 + mp * np_ * ob),
    )

    kernel = functools.partial(_linear_gelu_kernel, precision=precision)

    out_padded = pl.pallas_call(
        kernel,
        out_shape=jax.ShapeDtypeStruct((mp, np_), x.dtype),
        grid_spec=pltpu.PrefetchScalarGridSpec(
            num_scalar_prefetch=0,
            grid=grid,
            in_specs=[
                pl.BlockSpec((tm, tk), lambda i, j, kk: (i, kk)),   # x tile
                pl.BlockSpec((tk, tn), lambda i, j, kk: (kk, j)),   # W tile (K,N)
                pl.BlockSpec((1, tn), lambda i, j, kk: (0, j)),     # bias tile
            ],
            out_specs=pl.BlockSpec((tm, tn), lambda i, j, kk: (i, j)),
            scratch_shapes=[pltpu.VMEM((tm, tn), jnp.float32)],
        ),
        compiler_params=pltpu.CompilerParams(
            dimension_semantics=("parallel", "parallel", "arbitrary"),
            vmem_limit_bytes=vmem_limit,
        ),
        cost_estimate=cost,
    )(x_p, w_p, b_p)

    out = out_padded
    if mp != m or np_ != n:
        out = out[:m, :n]
    return out.reshape(orig_shape[:-1] + (n,))


if __name__ == "__main__":
    # Small shapes consistent with the module: batch=8 rows, in=32, out=32.
    in_channels, out_channels, batch = 32, 32, 8

    key = jax.random.PRNGKey(0)
    kx, kw, kb = jax.random.split(key, 3)

    # Deterministic parameter init mimicking PyTorch nn.Linear defaults.
    bound_w = 1.0 / math.sqrt(in_channels)
    weight = jax.random.uniform(
        kw, (out_channels, in_channels), jnp.float32, -bound_w, bound_w
    )
    bias = jax.random.uniform(kb, (out_channels,), jnp.float32, -bound_w, bound_w)
    x = jax.random.normal(kx, (batch, in_channels), jnp.float32)

    out = linear_block(x, weight, bias)
    out = jax.block_until_ready(out)

    # Pure-JAX reference check (exact erf GELU, same as nn.GELU default).
    ref = x @ weight.T + bias
    ref = 0.5 * ref * (1.0 + lax.erf(ref / math.sqrt(2.0)))
    assert out.shape == ref.shape
    assert jnp.allclose(out, ref, atol=1e-5, rtol=1e-5), "mismatch vs reference"

    print("KERNEL_OK")
</pallas_src>

<mosaic_0001>
module attributes {stable_mosaic.version = 11 : i64} {
  func.func @_linear_gelu_kernel(%arg0: i32, %arg1: i32, %arg2: i32, %arg3: memref<8x128xf32, #tpu.memory_space<vmem>>, %arg4: memref<128x128xf32, #tpu.memory_space<vmem>>, %arg5: memref<1x128xf32, #tpu.memory_space<vmem>>, %arg6: memref<8x128xf32, #tpu.memory_space<vmem>>, %arg7: memref<8x128xf32, #tpu.memory_space<vmem>>) attributes {dimension_semantics = [#tpu.dimension_semantics<parallel>, #tpu.dimension_semantics<parallel>, #tpu.dimension_semantics<arbitrary>], iteration_bounds = array<i64: 1, 1, 1>, scalar_prefetch = 0 : i64, scratch_operands = 1 : i64, tpu.core_type = #tpu.core_type<tc>, window_params = [{transform_indices = @transform_0, window_bounds = array<i64: 8, 128>}, {transform_indices = @transform_1, window_bounds = array<i64: 128, 128>}, {transform_indices = @transform_2, window_bounds = array<i64: 1, 128>}, {transform_indices = @transform_3, window_bounds = array<i64: 8, 128>}]} {
    %c0_i32 = arith.constant 0 : i32
    %0 = arith.cmpi eq, %arg2, %c0_i32 : i32
    %1 = arith.extui %0 : i1 to i32
    %c0_i32_0 = arith.constant 0 : i32
    %2 = arith.cmpi ne, %1, %c0_i32_0 : i32
    scf.if %2 {
      %c0_10 = arith.constant 0 : index
      %c0_11 = arith.constant 0 : index
      %12 = vector.load %arg5[%c0_10, %c0_11] : memref<1x128xf32, #tpu.memory_space<vmem>>, vector<1x128xf32>
      %13 = vector.shape_cast %12 : vector<1x128xf32> to vector<1x128xf32>
      %14 = vector.broadcast %13 : vector<1x128xf32> to vector<8x128xf32>
      %c0_12 = arith.constant 0 : index
      %c0_13 = arith.constant 0 : index
      %15 = vector.load %arg7[%c0_12, %c0_13] : memref<8x128xf32, #tpu.memory_space<vmem>>, vector<8x128xf32>
      tpu.vector_store %arg7[%c0_12, %c0_13], %14 {strides = array<i32>} : memref<8x128xf32, #tpu.memory_space<vmem>>, vector<8x128xf32>,
    } else {
    }
    %c0 = arith.constant 0 : index
    %c0_1 = arith.constant 0 : index
    %3 = vector.load %arg7[%c0, %c0_1] : memref<8x128xf32, #tpu.memory_space<vmem>>, vector<8x128xf32>
    %c0_2 = arith.constant 0 : index
    %c0_3 = arith.constant 0 : index
    %4 = vector.load %arg3[%c0_2, %c0_3] : memref<8x128xf32, #tpu.memory_space<vmem>>, vector<8x128xf32>
    %c0_4 = arith.constant 0 : index
    %c0_5 = arith.constant 0 : index
    %5 = vector.load %arg4[%c0_4, %c0_5] : memref<128x128xf32, #tpu.memory_space<vmem>>, vector<128x128xf32>
    %cst = arith.constant dense<0.000000e+00> : vector<8x128xf32>
    %6 = tpu.matmul %4, %5, %cst {dimension_numbers = #tpu.dot_dimension_numbers<[1], [0], [0], [1], [0, 0, 1, 1], [], []>, precision = #tpu.contract_precision<fp32>} : vector<8x128xf32>, vector<128x128xf32>, vector<8x128xf32> -> vector<8x128xf32>
    %7 = arith.addf %3, %6 : vector<8x128xf32>
    %c0_6 = arith.constant 0 : index
    %c0_7 = arith.constant 0 : index
    %8 = vector.load %arg7[%c0_6, %c0_7] : memref<8x128xf32, #tpu.memory_space<vmem>>, vector<8x128xf32>
    tpu.vector_store %arg7[%c0_6, %c0_7], %7 {strides = array<i32>} : memref<8x128xf32, #tpu.memory_space<vmem>>, vector<8x128xf32>,
    %c0_i32_8 = arith.constant 0 : i32
    %9 = arith.cmpi eq, %arg2, %c0_i32_8 : i32
    %10 = arith.extui %9 : i1 to i32
    %c0_i32_9 = arith.constant 0 : i32
    %11 = arith.cmpi ne, %10, %c0_i32_9 : i32
    scf.if %11 {
      %c0_10 = arith.constant 0 : index
      %c0_11 = arith.constant 0 : index
      %12 = vector.load %arg7[%c0_10, %c0_11] : memref<8x128xf32, #tpu.memory_space<vmem>>, vector<8x128xf32>
      %cst_12 = arith.constant 5.000000e-01 : f32
      %13 = vector.broadcast %cst_12 : f32 to vector<8x128xf32>
      %14 = arith.mulf %13, %12 : vector<8x128xf32>
      %cst_13 = arith.constant 0.707106769 : f32
      %15 = vector.broadcast %cst_13 : f32 to vector<8x128xf32>
      %16 = arith.mulf %12, %15 : vector<8x128xf32>
      %17 = math.erf %16 : vector<8x128xf32>
      %cst_14 = arith.constant 1.000000e+00 : f32
      %18 = vector.broadcast %cst_14 : f32 to vector<8x128xf32>
      %19 = arith.addf %18, %17 : vector<8x128xf32>
      %20 = arith.mulf %14, %19 : vector<8x128xf32>
      %c0_15 = arith.constant 0 : index
      %c0_16 = arith.constant 0 : index
      %21 = vector.load %arg6[%c0_15, %c0_16] : memref<8x128xf32, #tpu.memory_space<vmem>>, vector<8x128xf32>
      tpu.vector_store %arg6[%c0_15, %c0_16], %20 {strides = array<i32>} : memref<8x128xf32, #tpu.memory_space<vmem>>, vector<8x128xf32>,
    } else {
    }
    return
  }
  func.func @transform_0(%arg0: i32, %arg1: i32, %arg2: i32) -> (i32, i32) {
    %c0_i32 = arith.constant 0 : i32
    return %arg0, %arg2 : i32, i32
  }
  func.func @transform_1(%arg0: i32, %arg1: i32, %arg2: i32) -> (i32, i32) {
    %c0_i32 = arith.constant 0 : i32
    return %arg2, %arg1 : i32, i32
  }
  func.func @transform_2(%arg0: i32, %arg1: i32, %arg2: i32) -> (i32, i32) {
    %c0_i32 = arith.constant 0 : i32
    %c0_i32_0 = arith.constant 0 : i32
    return %c0_i32, %arg1 : i32, i32
  }
  func.func @transform_3(%arg0: i32, %arg1: i32, %arg2: i32) -> (i32, i32) {
    %c0_i32 = arith.constant 0 : i32
    return %arg0, %arg1 : i32, i32
  }
}

</mosaic_0001>

<bundles_post_ra>
// kernel: tpu_custom_call.1
= control target key start
LH: loop header
LB: loop body
LE: loop exit
PB: predicated region body
PF: predicated region fallthrough
CT: control target
= control target key end

     0   :  { %8 = vsyncpa [#allocation4], 0  ;;  %s844_s0 = inlined_call_operand.hbm [shape: f32[8,128], index: 0, kind: input, shape index: {}]   ;;  %s845_s1 = inlined_call_operand.hbm [shape: f32[128,128], index: 1, kind: input, shape index: {}]   ;;  %s846_s2 = inlined_call_operand.vmem [shape: f32[1,128], index: 2, kind: input, shape index: {}]   ;;  %s847_s3 = inlined_call_operand.hbm [shape: f32[8,128], index: 3, kind: output, shape index: {}]  }
   0x1   :  { %9 = vsyncpa [#allocation7], 0 }
   0x2   :  { %10 = vsyncpa [#allocation5], 0  ;;  %s16_s14 = sshll.u32 %s844_s0, 4  ;;  %s569_s15 = smov [#allocation3]   ;;  %s17_s14 = int_to_ptr.hbm [resolvable:$true] %s16_s14 }
   0x3   :  { %s18_s16 = sshll.u32 %s569_s15, 4  ;;  %s26_s19 = sshll.u32 %s845_s1, 4  ;;  %s19_s16 = int_to_ptr.vmem [resolvable:$true] %s18_s16  ;;  %s27_s19 = int_to_ptr.hbm [resolvable:$true] %s26_s19 }
   0x4   :  { %21 = dma.hbm_to_vmem [thread:$0]  %s17_s14, 128, %s19_s16, [#allocation4]  }
   0x5   :  { %s570_s20 = smov [#allocation6]   ;;  %s571_s22 = smov 128  }
   0x6   :  { %s28_s21 = sshll.u32 %s570_s20, 4  ;;  %s572_s23 = smov 8   ;;  %s29_s21 = int_to_ptr.vmem [resolvable:$true] %s28_s21 }
   0x7   :  { %34 = dma.hbm_to_vmem [thread:$0]  %s27_s19, 2048, %s29_s21, [#allocation7], %s571_s22, %s571_s22, %s572_s23  }
   0x8   :  { %563 = dma.done.wait [#allocation4], 128  }
   0x9   :  { %564 = vsyncadd [#allocation4], 4294967168 }
   0xa   :  { %565 = dma.done.wait [#allocation7], 2048  }
   0xb   :  { %566 = vsyncadd [#allocation7], 4294965248  ;;  %v71_v0 = vld [vmem:[#allocation6 + $0x78] sm:$0xff]  ;;  %v70_v1 = vld [vmem:[#allocation6 + $0x70] sm:$0xff]  ;;  %s471_s27 = sshll.u32 %s847_s3, 4  ;;  %s472_s27 = int_to_ptr.hbm [resolvable:$true] %s471_s27 }
   0xc   :  { %v69_v2 = vld [vmem:[#allocation6 + $0x68] sm:$0xff]  ;;  %v600_v3 = vand.u32 4294901760, %v71_v0  ;;  %v602_v4 = vand.u32 4294901760, %v70_v1  ;;  %v68_v6 = vld [vmem:[#allocation6 + $0x60] sm:$0xff]  ;;  %v67_v7 = vld [vmem:[#allocation6 + $0x58] sm:$0xff] }
   0xd   :  { %v604_v5 = vand.u32 4294901760, %v69_v2  ;;  %v66_v8 = vld [vmem:[#allocation6 + $0x50] sm:$0xff]  ;;  %v606_v9 = vand.u32 4294901760, %v68_v6  ;;  %v608_v10 = vand.u32 4294901760, %v67_v7  ;;  %v65_v12 = vld [vmem:[#allocation6 + $0x48] sm:$0xff]  ;;  %v64_v13 = vld [vmem:[#allocation6 + $0x40] sm:$0xff] }
   0xe   :  { %v610_v11 = vand.u32 4294901760, %v66_v8  ;;  %73 = vmatpush.msra.mxu0 %v600_v3  ;;  %v614_v14 = vsub.f32 %v71_v0, %v600_v3  ;;  %v617_v15 = vsub.f32 %v70_v1, %v602_v4  ;;  %v622_v17 = vand.u32 4294901760, %v65_v12  ;;  %v63_v18 = vld [vmem:[#allocation6 + $0x38] sm:$0xff]  ;;  %269 = vmatpush.msra.mxu3 %v600_v3  ;;  %v62_v26 = vld [vmem:[#allocation6 + $0x30] sm:$0xff]  ;;  %v61_v36 = vld [vmem:[#allocation6 + $0x28] sm:$0xff] }
   0xf   :  { %v620_v16 = vsub.f32 %v69_v2, %v604_v5  ;;  %v626_v19 = vsub.f32 %v68_v6, %v606_v9  ;;  %v629_v20 = vsub.f32 %v67_v7, %v608_v10  ;;  %v638_v25 = vand.u32 4294901760, %v64_v13  ;;  %v60_v42 = vld [vmem:[#allocation6 + $0x20] sm:$0xff]  ;;  %v59_v47 = vld [vmem:[#allocation6 + $0x18] sm:$0xff]  ;;  %v58_v55 = vld [vmem:[#allocation6 + $0x10] sm:$0xff] }
  0x10   :  { %v632_v21 = vsub.f32 %v66_v8, %v610_v11  ;;  %75 = vmatpush.msra.mxu0 %v602_v4  ;;  %v115_v22 = vand.u32 4294901760, %v614_v14  ;;  %v121_v23 = vand.u32 4294901760, %v617_v15  ;;  %216 = vmatpush.msra.mxu2 %v614_v14  ;;  %v642_v28 = vand.u32 4294901760, %v63_v18  ;;  %v57_v60 = vld [vmem:[#allocation6 + $0x8] sm:$0xff]  ;;  %v56_v1 = vld [vmem:[#allocation6] sm:$0xff]  ;;  %v55_v7 = vld [vmem:[#allocation3] sm:$0xff] }
  0x11   :  { %v127_v24 = vand.u32 4294901760, %v620_v16  ;;  %v133_v27 = vand.u32 4294901760, %v626_v19  ;;  %v645_v29 = vsub.f32 %v65_v12, %v622_v17  ;;  %271 = vmatpush.msra.mxu3 %v602_v4  ;;  %v139_v33 = vand.u32 4294901760, %v629_v20 }
  0x12   :  { %77 = vmatpush.msra.mxu0 %v604_v5  ;;  %v116_v30 = vsub.f32 %v614_v14, %v115_v22  ;;  %v122_v31 = vsub.f32 %v617_v15, %v121_v23  ;;  %219 = vmatpush.msra.mxu2 %v617_v15  ;;  %v145_v34 = vand.u32 4294901760, %v632_v21  ;;  %v661_v35 = vand.u32 4294901760, %v62_v26 }
  0x13   :  { %v128_v32 = vsub.f32 %v620_v16, %v127_v24  ;;  %273 = vmatpush.msra.mxu3 %v604_v5  ;;  %v134_v39 = vsub.f32 %v626_v19, %v133_v27  ;;  %v669_v40 = vsub.f32 %v64_v13, %v638_v25  ;;  %v151_v41 = vand.u32 4294901760, %v645_v29 }
  0x14   :  { %v117_v37 = vand.u32 4294901760, %v116_v30  ;;  %79 = vmatpush.msra.mxu0 %v606_v9  ;;  %v123_v38 = vand.u32 4294901760, %v122_v31  ;;  %222 = vmatpush.msra.mxu2 %v620_v16  ;;  %v140_v44 = vsub.f32 %v629_v20, %v139_v33  ;;  %v678_v45 = vand.u32 4294901760, %v61_v36 }
  0x15   :  { %275 = vmatpush.msra.mxu3 %v606_v9  ;;  %v129_v43 = vand.u32 4294901760, %v128_v32  ;;  %v681_v46 = vsub.f32 %v63_v18, %v642_v28  ;;  %v146_v48 = vsub.f32 %v632_v21, %v145_v34  ;;  %v135_v49 = vand.u32 4294901760, %v134_v39 }
  0x16   :  { %118 = vmatpush.msra.mxu1 %v117_v37  ;;  %81 = vmatpush.msra.mxu0 %v608_v10  ;;  %v157_v50 = vand.u32 4294901760, %v669_v40  ;;  %v690_v51 = vand.u32 4294901760, %v60_v42  ;;  %v693_v52 = vsub.f32 %v62_v26, %v661_v35  ;;  %v152_v53 = vsub.f32 %v645_v29, %v151_v41 }
  0x17   :  { %225 = vmatpush.msra.mxu2 %v626_v19  ;;  %277 = vmatpush.msra.mxu3 %v608_v10  ;;  %v698_v54 = vand.u32 4294901760, %v59_v47  ;;  %v141_v56 = vand.u32 4294901760, %v140_v44  ;;  %v163_v57 = vand.u32 4294901760, %v681_v46  ;;  %v705_v58 = vsub.f32 %v61_v36, %v678_v45 }
  0x18   :  { %124 = vmatpush.msra.mxu1 %v123_v38  ;;  %83 = vmatpush.msra.mxu0 %v610_v11  ;;  %v147_v59 = vand.u32 4294901760, %v146_v48  ;;  %v158_v61 = vsub.f32 %v669_v40, %v157_v50  ;;  %v169_v62 = vand.u32 4294901760, %v693_v52  ;;  %v714_v63 = vand.u32 4294901760, %v58_v55 }
  0x19   :  { %228 = vmatpush.msra.mxu2 %v629_v20  ;;  %279 = vmatpush.msra.mxu3 %v610_v11  ;;  %v717_v0 = vsub.f32 %v60_v42, %v690_v51  ;;  %v153_v2 = vand.u32 4294901760, %v152_v53  ;;  %v720_v6 = vsub.f32 %v59_v47, %v698_v54  ;;  %v164_v8 = vsub.f32 %v681_v46, %v163_v57 }
  0x1a   :  { %130 = vmatpush.msra.mxu1 %v129_v43  ;;  %85 = vmatpush.msra.mxu0 %v622_v17  ;;  %v175_v12 = vand.u32 4294901760, %v705_v58  ;;  %v729_v13 = vand.u32 4294901760, %v57_v60  ;;  %v731_v18 = vand.u32 4294901760, %v55_v7  ;;  %v733_v26 = vand.u32 4294901760, %v56_v1 }
  0x1b   :  { %231 = vmatpush.msra.mxu2 %v632_v21  ;;  %281 = vmatpush.msra.mxu3 %v622_v17  ;;  %v159_v30 = vand.u32 4294901760, %v158_v61  ;;  %v170_v31 = vsub.f32 %v693_v52, %v169_v62  ;;  %v181_v32 = vand.u32 4294901760, %v717_v0  ;;  %v743_v36 = vsub.f32 %v58_v55, %v714_v63 }
  0x1c   :  { %136 = vmatpush.msra.mxu1 %v135_v49  ;;  %87 = vmatpush.msra.mxu0 %v638_v25  ;;  %v187_v37 = vand.u32 4294901760, %v720_v6  ;;  %v165_v38 = vand.u32 4294901760, %v164_v8  ;;  %v176_v39 = vsub.f32 %v705_v58, %v175_v12  ;;  %v753_v42 = vsub.f32 %v57_v60, %v729_v13 }
  0x1d   :  { %234 = vmatpush.msra.mxu2 %v645_v29  ;;  %283 = vmatpush.msra.mxu3 %v638_v25  ;;  %v105_v43 = vsub.f32 %v55_v7, %v731_v18  ;;  %v171_v44 = vand.u32 4294901760, %v170_v31  ;;  %v182_v47 = vsub.f32 %v717_v0, %v181_v32  ;;  %v193_v48 = vand.u32 4294901760, %v743_v36 }
  0x1e   :  { %142 = vmatpush.msra.mxu1 %v141_v56  ;;  %89 = vmatpush.msra.mxu0 %v642_v28  ;;  %v764_v49 = vsub.f32 %v56_v1, %v733_v26  ;;  %v177_v53 = vand.u32 4294901760, %v176_v39  ;;  %v188_v55 = vsub.f32 %v720_v6, %v187_v37  ;;  %v199_v56 = vand.u32 4294901760, %v753_v42 }
  0x1f   :  { %237 = vmatpush.msra.mxu2 %v669_v40  ;;  %285 = vmatpush.msra.mxu3 %v642_v28  ;;  %v183_v60 = vand.u32 4294901760, %v182_v47  ;;  %v194_v61 = vsub.f32 %v743_v36, %v193_v48 }
  0x20   :  { %148 = vmatpush.msra.mxu1 %v147_v59  ;;  %91 = vmatpush.msra.mxu0 %v661_v35  ;;  %v106_v59 = vand.u32 4294901760, %v105_v43  ;;  %v205_v1 = vand.u32 4294901760, %v764_v49  ;;  %v200_v7 = vsub.f32 %v753_v42, %v199_v56 }
  0x21   :  { %240 = vmatpush.msra.mxu2 %v681_v46  ;;  %287 = vmatpush.msra.mxu3 %v661_v35 }
  0x22   :  { %154 = vmatpush.msra.mxu1 %v153_v2  ;;  %93 = vmatpush.msra.mxu0 %v678_v45  ;;  %v189_v2 = vand.u32 4294901760, %v188_v55  ;;  %v107_v8 = vsub.f32 %v105_v43, %v106_v59  ;;  %v206_v31 = vsub.f32 %v764_v49, %v205_v1 }
  0x23   :  { %243 = vmatpush.msra.mxu2 %v693_v52  ;;  %289 = vmatpush.msra.mxu3 %v678_v45 }
  0x24   :  { %160 = vmatpush.msra.mxu1 %v159_v30  ;;  %95 = vmatpush.msra.mxu0 %v690_v51  ;;  %v195_v30 = vand.u32 4294901760, %v194_v61  ;;  %v108_v39 = vand.u32 4294901760, %v107_v8 }
  0x25   :  { %246 = vmatpush.msra.mxu2 %v705_v58  ;;  %291 = vmatpush.msra.mxu3 %v690_v51 }
  0x26   :  { %166 = vmatpush.msra.mxu1 %v165_v38  ;;  %97 = vmatpush.msra.mxu0 %v698_v54  ;;  %v201_v38 = vand.u32 4294901760, %v200_v7 }
  0x27   :  { %249 = vmatpush.msra.mxu2 %v717_v0  ;;  %293 = vmatpush.msra.mxu3 %v698_v54 }
  0x28   :  { %172 = vmatpush.msra.mxu1 %v171_v44  ;;  %99 = vmatpush.msra.mxu0 %v714_v63  ;;  %v207_v44 = vand.u32 4294901760, %v206_v31 }
  0x29   :  { %252 = vmatpush.msra.mxu2 %v720_v6  ;;  %295 = vmatpush.msra.mxu3 %v714_v63 }
  0x2a   :  { %178 = vmatpush.msra.mxu1 %v177_v53  ;;  %101 = vmatpush.msra.mxu0 %v729_v13 }
  0x2b   :  { %255 = vmatpush.msra.mxu2 %v743_v36  ;;  %297 = vmatpush.msra.mxu3 %v729_v13 }
  0x2c   :  { %184 = vmatpush.msra.mxu1 %v183_v60  ;;  %103 = vmatpush.msra.mxu0 %v733_v26 }
  0x2d   :  { %258 = vmatpush.msra.mxu2 %v753_v42  ;;  %299 = vmatpush.msra.mxu3 %v733_v26 }
  0x2e   :  { %310 = vmatpush.msrb.mxu0 %v115_v22  ;;  %190 = vmatpush.msra.mxu1 %v189_v2 }
  0x2f   :  { %261 = vmatpush.msra.mxu2 %v764_v49  ;;  %303 = vmatmul.f32.vlgmr.msra.gmra.mxu3 %v106_v59 }
  0x30   :  { %314 = vmatpush.msrb.mxu0 %v121_v23  ;;  %196 = vmatpush.msra.mxu1 %v195_v30 }
  0x31   :  { %264 = vmatmul.f32.vlgmr.msra.gmra.mxu2 %v105_v43  ;;  %109 = vmatmul.f32.vlgmr.msra.gmra.mxu0 %v108_v39 }
  0x32   :  { %318 = vmatpush.msrb.mxu0 %v127_v24  ;;  %202 = vmatpush.msra.mxu1 %v201_v38 }
  0x34   :  { %322 = vmatpush.msrb.mxu0 %v133_v27  ;;  %208 = vmatpush.msra.mxu1 %v207_v44 }
  0x35   :  { %210 = vmatmul.f32.vlgmr.msra.gmra.mxu1 %v731_v18 }
  0x36   :  { %377 = vmatpush.msrb.mxu1 %v600_v3  ;;  %326 = vmatpush.msrb.mxu0 %v139_v33 }
  0x38   :  { %379 = vmatpush.msrb.mxu1 %v602_v4  ;;  %330 = vmatpush.msrb.mxu0 %v145_v34 }
  0x3a   :  { %381 = vmatpush.msrb.mxu1 %v604_v5  ;;  %334 = vmatpush.msrb.mxu0 %v151_v41 }
  0x3c   :  { %383 = vmatpush.msrb.mxu1 %v606_v9  ;;  %338 = vmatpush.msrb.mxu0 %v157_v50 }
  0x3e   :  { %385 = vmatpush.msrb.mxu1 %v608_v10  ;;  %342 = vmatpush.msrb.mxu0 %v163_v57 }
  0x40   :  { %387 = vmatpush.msrb.mxu1 %v610_v11  ;;  %346 = vmatpush.msrb.mxu0 %v169_v62 }
  0x42   :  { %389 = vmatpush.msrb.mxu1 %v622_v17  ;;  %350 = vmatpush.msrb.mxu0 %v175_v12  ;;  %v488_v17 = vld [vmem:[%s846_s2] ss:$0 sm:$0xff]  ;;  %s573_s2 = smov [#allocation8]  }
  0x43   :  { %s469_s24 = sshll.u32 %s573_s2, 4  ;;  %s470_s24 = int_to_ptr.vmem [resolvable:$true] %s469_s24 }
  0x44   :  { %391 = vmatpush.msrb.mxu1 %v638_v25  ;;  %354 = vmatpush.msrb.mxu0 %v181_v32 }
  0x46   :  { %393 = vmatpush.msrb.mxu1 %v642_v28  ;;  %358 = vmatpush.msrb.mxu0 %v187_v37 }
  0x48   :  { %395 = vmatpush.msrb.mxu1 %v661_v35  ;;  %362 = vmatpush.msrb.mxu0 %v193_v48 }
  0x4a   :  { %397 = vmatpush.msrb.mxu1 %v678_v45  ;;  %366 = vmatpush.msrb.mxu0 %v199_v56 }
  0x4c   :  { %399 = vmatpush.msrb.mxu1 %v690_v51  ;;  %370 = vmatpush.msrb.mxu0 %v205_v1 }
  0x4d   :  { %372 = vmatmul.f32.vlgmr.msrb.gmra.mxu0 %v731_v18 }
  0x4e   :  { %401 = vmatpush.msrb.mxu1 %v698_v54 }
  0x50   :  { %403 = vmatpush.msrb.mxu1 %v714_v63 }
  0x52   :  { %405 = vmatpush.msrb.mxu1 %v729_v13 }
  0x54   :  { %407 = vmatpush.msrb.mxu1 %v733_v26 }
  0x55   :  { %409 = vmatmul.f32.vlgmr.msrb.gmra.mxu1 %v731_v18 }
  0xae   :  { %v110_v4 = vpop.f32.mrf.mxu0 }
  0xb2   :  { %v211_v3 = vpop.f32.mrf.mxu1  ;;  %v304_v11 = vpop.f32.mrf.mxu3 }
  0xb3   :  { %v212_v5 = vadd.f32 %v211_v3, %v110_v4 }
  0xb4   :  { %v265_v9 = vpop.f32.mrf.mxu2 }
  0xb5   :  { %v266_v10 = vadd.f32 %v265_v9, %v212_v5 }
  0xb7   :  { %v305_v14 = vadd.f32 %v304_v11, %v266_v10 }
  0xca   :  { %v373_v15 = vpop.f32.mrf.mxu0 }
  0xcb   :  { %v374_v16 = vadd.f32 %v373_v15, %v305_v14 }
  0xd2   :  { %v410_v19 = vpop.f32.mrf.mxu1 }
  0xd3   :  { %v411_v20 = vadd.f32 %v410_v19, %v374_v16 }
  0xd5   :  { %v413_v21 = vadd.f32 %v488_v17, %v411_v20 }
  0xd7   :  { %v420_v22 = vmul.f32 0.70710677, %v413_v21  ;;  %v419_v53 = vmul.f32 0.5, %v413_v21 }
  0xd9   :  { %v421_v23 = vmul.f32 %v420_v22, %v420_v22 }
  0xdb   :  { %v422_v24 = vmin.f32 %v421_v23, 16.0 }
  0xdd   :  { %v423_v25 = vmul.f32 2.1237322e-06, %v422_v24  ;;  %v434_v27 = vmul.f32 3.8918573e-05, %v422_v24 }
  0xdf   :  { %v424_v28 = vadd.f32 0.00028619796, %v423_v25  ;;  %v435_v29 = vadd.f32 0.001143296, %v434_v27 }
  0xe1   :  { %v425_v33 = vmul.f32 %v424_v28, %v422_v24  ;;  %v436_v34 = vmul.f32 %v435_v29, %v422_v24 }
  0xe3   :  { %v437_v35 = vadd.f32 0.014752088, %v436_v34  ;;  %v426_v40 = vadd.f32 0.0036580483, %v425_v33 }
  0xe5   :  { %v438_v41 = vmul.f32 %v437_v35, %v422_v24  ;;  %v427_v46 = vmul.f32 %v426_v40, %v422_v24 }
  0xe7   :  { %v439_v45 = vadd.f32 0.112945676, %v438_v41  ;;  %v428_v52 = vadd.f32 0.05243302, %v427_v46 }
  0xe9   :  { %v440_v50 = vmul.f32 %v439_v45, %v422_v24  ;;  %v429_v58 = vmul.f32 %v428_v52, %v422_v24 }
  0xeb   :  { %v441_v51 = vadd.f32 0.4994258, %v440_v50  ;;  %v430_v62 = vadd.f32 0.18741608, %v429_v58 }
  0xed   :  { %v442_v54 = vmul.f32 %v441_v51, %v422_v24  ;;  %v431_v0 = vmul.f32 %v430_v62, %v422_v24 }
  0xef   :  { %v443_v57 = vadd.f32 1.0, %v442_v54  ;;  %v432_v18 = vadd.f32 1.1283791, %v431_v0 }
  0xf1   :  { %489 = vrcp.f32 %v443_v57  ;;  %v455_v13 = vand.u32 2147483648, %v443_v57  ;;  %v453_v32 = vand.u32 2147483647, %v443_v57  ;;  %vm449_vm1 = vweird.f32 %v443_v57 }
  0xf2   :  { %v433_v42 = vmul.f32 %v432_v18, %v420_v22 }
  0xf3   :  { %v456_v37 = vor.u32 1.1754944e-38, %v455_v13  ;;  %vm454_vm3 = vcmp.eq.f32.partialorder %v453_v32, 8.507059e+37 }
  0xf7   :  { %v490_v63 = vpop.eup %489 }
  0xf8   :  { %v445_v6 = vmul.f32 %v490_v63, %v443_v57  ;;  %vm450_vm0 = vweird.f32 %v490_v63 }
  0xf9   :  { %vm451_vm2 = vmor %vm449_vm1, %vm450_vm0 }
  0xfa   :  { %v446_v12 = vsub.f32 1.0, %v445_v6 }
  0xfc   :  { %v447_v26 = vmul.f32 %v490_v63, %v446_v12 }
  0xfe   :  { %v448_v36 = vadd.f32 %v490_v63, %v447_v26 }
 0x100   :  { %v452_v43 = vsel %vm451_vm2, %v490_v63, %v448_v36 }
 0x101   :  { %v457_v47 = vsel %vm454_vm3, %v456_v37, %v452_v43 }
 0x102   :  { %v458_v48 = vmul.f32 %v457_v47, %v433_v42 }
 0x104   :  { %v482_v49 = vclamps-f32 %v458_v48, 1.0 }
 0x106   :  { %v461_v55 = vadd.f32 1.0, %v482_v49 }
 0x108   :  { %v462_v56 = vmul.f32 %v461_v55, %v419_v53 }
 0x10a   :  { %463 = vst [vmem:[#allocation8] sm:$0xff] %v462_v56 }
 0x10b   :  { %474 = dma.vmem_to_hbm [thread:$0]  %s470_s24, 128, %s472_s27, [#allocation5]  }
 0x10c   :  { %567 = dma.done.wait [#allocation5], 128  }
 0x10d   :  { %568 = vsyncadd [#allocation5], 4294967168 }
 0x10e   :  { %479 = vsyncpa [#allocation4], 1 }
 0x10f   :  { %480 = vsyncpa [#allocation7], 1 }
 0x110   :  { %481 = vsyncpa [#allocation5], 1 }

</bundles_post_ra>
